<compile_context>
chip_gen: v7x
topology: tpu7x:2x2x1
jax: 0.10.0
libtpu: 0.0.40
codegen_flags: <defaults>
</compile_context>

<pallas_src>
import jax
import jax.numpy as jnp
from jax.experimental import pallas as pl
from jax.experimental.pallas import tpu as pltpu


# ----------------------------------------------------------------------------
# Kernel
# ----------------------------------------------------------------------------
def _linear_kernel(x_ref, w_ref, b_ref, o_ref, acc_ref):
    """One (tm, tn) output tile, accumulating over the K grid axis (axis 2)."""
    k = pl.program_id(2)

    @pl.when(k == 0)
    def _init():
        # Fold the bias into the accumulator init (removes a finalize VPU add).
        acc_ref[...] = jnp.broadcast_to(
            b_ref[...].astype(jnp.float32), acc_ref.shape
        )

    # Cast the activation tile to the weight dtype (bf16) on the VPU, then MXU
    # matmul with f32 accumulation.  x is DMA'd from HBM in f32, so the wrapper
    # never pays the separate cast pass.
    acc_ref[...] += jnp.dot(
        x_ref[...].astype(w_ref.dtype),
        w_ref[...],
        preferred_element_type=jnp.float32,
    )

    @pl.when(k == pl.num_programs(2) - 1)
    def _finalize():
        o_ref[...] = acc_ref[...].astype(o_ref.dtype)


# ----------------------------------------------------------------------------
# Tile / VMEM heuristics
# ----------------------------------------------------------------------------
def _round_up(x, m):
    return ((x + m - 1) // m) * m


def _vmem_budget_bytes():
    """Per-core VMEM budget with headroom for Mosaic internals / pipelining."""
    cap = 64 * 1024 * 1024  # conservative default (v7x per-core VMEM)
    try:
        info = pltpu.get_tpu_info()
        cap = int(getattr(info, "vmem_capacity_bytes", cap)) or cap
    except Exception:
        pass
    # Leave ~16 MiB for compiler scratch, semaphores, double-buffer slack.
    return max(32 * 1024 * 1024, cap - 16 * 1024 * 1024)


def _vmem_need(tm, tn, tk, x_bytes, w_bytes, b_bytes, o_bytes):
    # Double-buffered inputs/outputs + f32 accumulator scratch.
    return (
        2 * tm * tk * x_bytes
        + 2 * tk * tn * w_bytes
        + 2 * 1 * tn * b_bytes
        + 2 * tm * tn * o_bytes
        + tm * tn * 4
    )


def _select_tiles(M_pad, K, N, x_bytes, w_bytes, b_bytes, o_bytes, budget,
                  fixed_tm=None, fixed_tn=None, fixed_tk=None):
    """Pick (tm, tn, tk) minimizing modeled HBM traffic under the VMEM budget."""

    def cands(dim, base, fixed):
        if fixed is not None:
            return [fixed]
        c = {v for v in base if v <= dim and dim % v == 0}
        c.add(dim)  # full-extent block is always legal
        return sorted(c, reverse=True)

    tm_c = cands(M_pad, (1024, 512, 256, 128, 64, 32, 16, 8), fixed_tm)
    tn_c = cands(N, (2048, 1024, 512, 256, 128), fixed_tn)
    tk_c = cands(K, (2048, 1024, 512, 256, 128), fixed_tk)

    best, best_key = None, None
    for tm in tm_c:
        for tn in tn_c:
            for tk in tk_c:
                need = _vmem_need(tm, tn, tk, x_bytes, w_bytes, b_bytes, o_bytes)
                fits = need <= budget
                gm = max(1, M_pad // max(tm, 1))
                gn = max(1, N // max(tn, 1))
                gk = max(1, K // max(tk, 1))
                # Approximate HBM traffic; Pallas elides re-fetch when a block
                # index is unchanged between consecutive grid steps, so a fully
                # resident W (gn == gk == 1) is read exactly once.
                x_traffic = M_pad * K * x_bytes * (gn if gk > 1 else 1)
                w_traffic = K * N * w_bytes * (1 if (gn == 1 and gk == 1) else gm)
                o_traffic = M_pad * N * o_bytes
                traffic = x_traffic + w_traffic + o_traffic
                # Keep >= 2 blocks on the parallel axes when traffic-neutral so
                # v7x's second TensorCore gets work.
                single_core_penalty = 1 if gm * gn < 2 else 0
                key = (0 if fits else 1, traffic, single_core_penalty,
                       gm * gn * gk, -tk, -tm)
                if best_key is None or key < best_key:
                    best_key, best = key, (tm, tn, tk)
    return best


# ----------------------------------------------------------------------------
# Host-side wrapper
# ----------------------------------------------------------------------------
def pallas_linear(x2d, w, b, *, tm=None, tn=None, tk=None, out_dtype=None):
    """y = x2d @ w + b as a tiled Pallas TPU kernel.

    x2d: [M, K] (any float dtype, typically f32)
    w:   [K, N] (typically bf16)
    b:   [N]    (f32)
    ->   [M, N] in out_dtype (default x2d.dtype)
    """
    M, K = x2d.shape
    K2, N = w.shape
    assert K == K2, (K, K2)
    out_dtype = out_dtype or x2d.dtype

    x_bytes = jnp.dtype(x2d.dtype).itemsize
    w_bytes = jnp.dtype(w.dtype).itemsize
    b_bytes = jnp.dtype(b.dtype).itemsize
    o_bytes = jnp.dtype(out_dtype).itemsize

    budget = _vmem_budget_bytes()

    # Pad M up to a tile-friendly size (avoids tiny ragged tm tiles that
    # under-fill the MXU rows); padded rows are sliced off at the end.
    if tm is not None:
        M_pad = _round_up(max(M, 1), tm)
    else:
        m_align = 256 if M >= 512 else (64 if M >= 64 else 8)
        M_pad = _round_up(max(M, 8), m_align)

    tm, tn, tk = _select_tiles(
        M_pad, K, N, x_bytes, w_bytes, b_bytes, o_bytes, budget,
        fixed_tm=tm, fixed_tn=tn, fixed_tk=tk,
    )
    assert M_pad % tm == 0 and N % tn == 0 and K % tk == 0, (M_pad, N, K, tm, tn, tk)

    if M_pad != M:
        x2d = jnp.pad(x2d, ((0, M_pad - M), (0, 0)))

    b2d = b.reshape(1, N)

    need = _vmem_need(tm, tn, tk, x_bytes, w_bytes, b_bytes, o_bytes)
    vmem_limit = int(min(budget, max(2 * need, 8 * 1024 * 1024)))

    grid = (M_pad // tm, N // tn, K // tk)  # reduction axis (K) last

    out = pl.pallas_call(
        _linear_kernel,
        out_shape=jax.ShapeDtypeStruct((M_pad, N), out_dtype),
        grid_spec=pltpu.PrefetchScalarGridSpec(
            num_scalar_prefetch=0,
            grid=grid,
            in_specs=[
                pl.BlockSpec((tm, tk), lambda i, j, k: (i, k)),  # x tile (f32)
                pl.BlockSpec((tk, tn), lambda i, j, k: (k, j)),  # w tile (bf16)
                pl.BlockSpec((1, tn), lambda i, j, k: (0, j)),   # bias per N-tile
            ],
            out_specs=pl.BlockSpec((tm, tn), lambda i, j, k: (i, j)),
            scratch_shapes=[pltpu.VMEM((tm, tn), jnp.float32)],
        ),
        compiler_params=pltpu.CompilerParams(
            dimension_semantics=("parallel", "parallel", "arbitrary"),
            vmem_limit_bytes=vmem_limit,
        ),
    )(x2d, w, b2d)

    if M_pad != M:
        out = out[:M]
    return out


# ----------------------------------------------------------------------------
# Modules
# ----------------------------------------------------------------------------
class InnerLinear:
    """Deterministic inner module (Linear) whose forward runs the Pallas kernel.

    Weights are bf16 (MXU-native); bias stays f32 and is folded into the f32
    accumulator; activations stay f32 in HBM and are cast per-tile in-kernel.
    """

    def __init__(self, hidden, key, param_dtype=jnp.bfloat16):
        k_w, k_b = jax.random.split(key)
        w = jax.random.normal(k_w, (hidden, hidden), jnp.float32) / jnp.sqrt(hidden)
        self.w = w.astype(param_dtype)
        self.b = jax.random.normal(k_b, (hidden,), jnp.float32) * 0.01

    def __call__(self, x):
        batch, seq, hidden = x.shape
        x2d = x.reshape(batch * seq, hidden)  # no dtype cast in the wrapper
        y2d = pallas_linear(x2d, self.w, self.b, out_dtype=x.dtype)
        return y2d.reshape(batch, seq, hidden)


class Residual:
    """Faithful port of the PyTorch Residual wrapper: pure delegation.

    Note: per the original module, it does NOT add the input back in.
    """

    def __init__(self, module):
        self.module = module

    def __call__(self, *args, **kwargs):
        return self.module(*args, **kwargs)


# ----------------------------------------------------------------------------
# Demo / correctness checks
# ----------------------------------------------------------------------------
if __name__ == "__main__":
    key = jax.random.PRNGKey(0)
    k_x, k_m = jax.random.split(key)

    # Small demo shape; hidden is lane-aligned (multiple of 128).
    batch, seq, hidden = 2, 8, 256
    x = jax.random.normal(k_x, (batch, seq, hidden), jnp.float32)

    model = Residual(InnerLinear(hidden, k_m))
    y = jax.block_until_ready(model(x))
    assert y.shape == (batch, seq, hidden)

    # Reference with matching numerics (bf16 operands, f32 accumulate + bias).
    x2d = x.reshape(-1, hidden)
    ref2d = (
        jnp.dot(x2d.astype(model.module.w.dtype), model.module.w,
                preferred_element_type=jnp.float32)
        + model.module.b
    ).astype(x.dtype)
    ref = ref2d.reshape(batch, seq, hidden)
    err = float(jnp.max(jnp.abs(y - ref)))
    assert jnp.allclose(y, ref, atol=2e-2, rtol=2e-2), err

    # Exercise the multi-step (i, j, k) grid with forced small tiles to validate
    # the pl.when bias-init / accumulate / finalize path.
    y_tiled = pallas_linear(x2d, model.module.w, model.module.b,
                            tm=8, tn=128, tk=128, out_dtype=x.dtype)
    y_tiled = jax.block_until_ready(y_tiled).reshape(batch, seq, hidden)
    assert jnp.allclose(y_tiled, ref, atol=2e-2, rtol=2e-2)

    # Exercise the ragged-M padding path (M not a multiple of the tile).
    y_ragged = pallas_linear(x2d[:10], model.module.w, model.module.b,
                             out_dtype=x.dtype)
    y_ragged = jax.block_until_ready(y_ragged)
    assert y_ragged.shape == (10, hidden)
    assert jnp.allclose(y_ragged, ref2d[:10], atol=2e-2, rtol=2e-2)

    print("KERNEL_OK")
</pallas_src>

<mosaic_0001>
module attributes {stable_mosaic.version = 11 : i64} {
  func.func @_linear_kernel(%arg0: i32, %arg1: i32, %arg2: i32, %arg3: memref<16x256xf32, #tpu.memory_space<vmem>>, %arg4: memref<256x128xbf16, #tpu.memory_space<vmem>>, %arg5: memref<1x128xf32, #tpu.memory_space<vmem>>, %arg6: memref<16x128xf32, #tpu.memory_space<vmem>>, %arg7: memref<16x128xf32, #tpu.memory_space<vmem>>) attributes {dimension_semantics = [#tpu.dimension_semantics<parallel>, #tpu.dimension_semantics<parallel>, #tpu.dimension_semantics<arbitrary>], iteration_bounds = array<i64: 1, 2, 1>, scalar_prefetch = 0 : i64, scratch_operands = 1 : i64, tpu.core_type = #tpu.core_type<tc>, window_params = [{transform_indices = @transform_0, window_bounds = array<i64: 16, 256>}, {transform_indices = @transform_1, window_bounds = array<i64: 256, 128>}, {transform_indices = @transform_2, window_bounds = array<i64: 1, 128>}, {transform_indices = @transform_3, window_bounds = array<i64: 16, 128>}]} {
    %c0_i32 = arith.constant 0 : i32
    %0 = arith.cmpi eq, %arg2, %c0_i32 : i32
    %1 = arith.extui %0 : i1 to i32
    %c0_i32_0 = arith.constant 0 : i32
    %2 = arith.cmpi ne, %1, %c0_i32_0 : i32
    scf.if %2 {
      %c0_10 = arith.constant 0 : index
      %c0_11 = arith.constant 0 : index
      %13 = vector.load %arg5[%c0_10, %c0_11] : memref<1x128xf32, #tpu.memory_space<vmem>>, vector<1x128xf32>
      %14 = vector.shape_cast %13 : vector<1x128xf32> to vector<1x128xf32>
      %15 = vector.broadcast %14 : vector<1x128xf32> to vector<16x128xf32>
      %c0_12 = arith.constant 0 : index
      %c0_13 = arith.constant 0 : index
      %16 = vector.load %arg7[%c0_12, %c0_13] : memref<16x128xf32, #tpu.memory_space<vmem>>, vector<16x128xf32>
      tpu.vector_store %arg7[%c0_12, %c0_13], %15 {strides = array<i32>} : memref<16x128xf32, #tpu.memory_space<vmem>>, vector<16x128xf32>,
    } else {
    }
    %c0 = arith.constant 0 : index
    %c0_1 = arith.constant 0 : index
    %3 = vector.load %arg7[%c0, %c0_1] : memref<16x128xf32, #tpu.memory_space<vmem>>, vector<16x128xf32>
    %c0_2 = arith.constant 0 : index
    %c0_3 = arith.constant 0 : index
    %4 = vector.load %arg3[%c0_2, %c0_3] : memref<16x256xf32, #tpu.memory_space<vmem>>, vector<16x256xf32>
    %5 = arith.truncf %4 : vector<16x256xf32> to vector<16x256xbf16>
    %c0_4 = arith.constant 0 : index
    %c0_5 = arith.constant 0 : index
    %6 = vector.load %arg4[%c0_4, %c0_5] : memref<256x128xbf16, #tpu.memory_space<vmem>>, vector<256x128xbf16>
    %cst = arith.constant dense<0.000000e+00> : vector<16x128xf32>
    %7 = tpu.matmul %5, %6, %cst {dimension_numbers = #tpu.dot_dimension_numbers<[1], [0], [0], [1], [0, 0, 1, 1], [], []>} : vector<16x256xbf16>, vector<256x128xbf16>, vector<16x128xf32> -> vector<16x128xf32>
    %8 = arith.addf %3, %7 : vector<16x128xf32>
    %c0_6 = arith.constant 0 : index
    %c0_7 = arith.constant 0 : index
    %9 = vector.load %arg7[%c0_6, %c0_7] : memref<16x128xf32, #tpu.memory_space<vmem>>, vector<16x128xf32>
    tpu.vector_store %arg7[%c0_6, %c0_7], %8 {strides = array<i32>} : memref<16x128xf32, #tpu.memory_space<vmem>>, vector<16x128xf32>,
    %c0_i32_8 = arith.constant 0 : i32
    %10 = arith.cmpi eq, %arg2, %c0_i32_8 : i32
    %11 = arith.extui %10 : i1 to i32
    %c0_i32_9 = arith.constant 0 : i32
    %12 = arith.cmpi ne, %11, %c0_i32_9 : i32
    scf.if %12 {
      %c0_10 = arith.constant 0 : index
      %c0_11 = arith.constant 0 : index
      %13 = vector.load %arg7[%c0_10, %c0_11] : memref<16x128xf32, #tpu.memory_space<vmem>>, vector<16x128xf32>
      %c0_12 = arith.constant 0 : index
      %c0_13 = arith.constant 0 : index
      %14 = vector.load %arg6[%c0_12, %c0_13] : memref<16x128xf32, #tpu.memory_space<vmem>>, vector<16x128xf32>
      tpu.vector_store %arg6[%c0_12, %c0_13], %13 {strides = array<i32>} : memref<16x128xf32, #tpu.memory_space<vmem>>, vector<16x128xf32>,
    } else {
    }
    return
  }
  func.func @transform_0(%arg0: i32, %arg1: i32, %arg2: i32) -> (i32, i32) {
    %c0_i32 = arith.constant 0 : i32
    return %arg0, %arg2 : i32, i32
  }
  func.func @transform_1(%arg0: i32, %arg1: i32, %arg2: i32) -> (i32, i32) {
    %c0_i32 = arith.constant 0 : i32
    return %arg2, %arg1 : i32, i32
  }
  func.func @transform_2(%arg0: i32, %arg1: i32, %arg2: i32) -> (i32, i32) {
    %c0_i32 = arith.constant 0 : i32
    %c0_i32_0 = arith.constant 0 : i32
    return %c0_i32, %arg1 : i32, i32
  }
  func.func @transform_3(%arg0: i32, %arg1: i32, %arg2: i32) -> (i32, i32) {
    %c0_i32 = arith.constant 0 : i32
    return %arg0, %arg1 : i32, i32
  }
}

</mosaic_0001>

<bundles_post_ra>
// kernel: tpu_custom_call.1
= control target key start
LH: loop header
LB: loop body
LE: loop exit
PB: predicated region body
PF: predicated region fallthrough
CT: control target
= control target key end

     0   :  { %8 = vsyncpa [#allocation4], 0  ;;  %s1164_s0 = inlined_call_operand.hbm [shape: f32[16,256], index: 0, kind: input, shape index: {}]   ;;  %s1165_s1 = inlined_call_operand.hbm [shape: bf16[256,256], index: 1, kind: input, shape index: {}]   ;;  %s1166_s2 = inlined_call_operand.vmem [shape: f32[1,256], index: 2, kind: input, shape index: {}]   ;;  %s1167_s3 = inlined_call_operand.hbm [shape: f32[16,256], index: 3, kind: output, shape index: {}]  }
   0x1   :  { %9 = vsyncpa [#allocation7], 0 }
   0x2   :  { %11 = vsyncpa [#allocation7 + $0x1], 0 }
   0x3   :  { %12 = vsyncpa [#allocation5], 0 }
   0x4   :  { %14 = vsyncpa [#allocation5 + $0x1], 0  ;;  %s920_s12 = smov 0   ;;  %s922_s13 = smov 0  }
   0x5   :  { %s924_s14 = smov 0   ;;  %s926_s15 = smov 0  }
   0x6   :  { %s928_s16 = smov 0   ;;  %s930_s17 = smov 0  }
   0x7 LB: > { %s592_s18 = sadd.s32 4294967295, %s887_s17   ;;  %s593_s19 = sadd.s32 4294967294, %s887_s17   ;;  %s887_s17 = sphi %s930_s17, %s20_s17   ;;  %s883_s16 = sphi %s928_s16, %s1193_s16   ;;  %s879_s15 = sphi %s926_s15, %s1192_s15   ;;  %s875_s14 = sphi %s924_s14, %s1191_s14   ;;  %s871_s13 = sphi %s922_s13, %s1190_s13   ;;  %s867_s12 = sphi %s920_s12, %s1189_s12  }
   0x8   : > { %p83_p0 = scmp.ne.s32.totalorder %s875_s14, %s871_s13  ;;  %p84_p1 = scmp.eq.s32.totalorder %s887_s17, 0 }
   0x9   : > { %p89_p2 = scmp.ne.s32.totalorder %s871_s13, %s867_s12  ;;  %p957_p3 = scmp.eq.s32.totalorder %s592_s18, 0 }
   0xa   : > { %p961_p4 = por %p84_p1, %p83_p0  ;;  %p141_p5 = scmp.eq.s32.totalorder %s592_s18, 1 }
   0xb   : > { %s1174_s20 = scalar_select %p957_p3, 1, 0 }
   0xc   : > { %p967_p6 = por %p957_p3, %p89_p2  ;;  %p147_p7 = scmp.eq.s32.totalorder %s593_s19, 1 }
   0xd   : > { %p971_p8 = por %p141_p5, %p83_p0  ;;  %p594_p9 = scmp.ge.s32.totalorder %s887_s17, 1 }
   0xe   : > { %s1176_s22 = scalar_select %p967_p6, 1, 0 }
   0xf   : > { %s1177_s23 = scalar_select %p971_p8, 1, 0 }
  0x10   : > { %p976_p10 = por %p147_p7, %p89_p2  ;;  %p154_p11 = scmp.lt.s32.totalorder %s887_s17, 3 }
  0x11   : > { %s889_s26 = smov [#allocation3]   ;;  %p667_p1 = scmp.lt.s32.totalorder %s887_s17, 2 }
  0x12   : > { %s1178_s24 = scalar_select %p976_p10, 1, 0 }
  0x13   : > { %p981_p12 = pnand %p594_p9, %p154_p11  ;;  %s172_s27 = sshll.u32 %s889_s26, 4  ;;  %s985_s27 = int_to_ptr.vmem [resolvable:$true] %s172_s27 }
  0x14   : > { %p999_p2 = pnand %p667_p1, %p961_p4  ;;  %s35_s30 = sadd.s32 1, %s883_s16 }
  0x15   : > { %s1179_s25 = scalar_select %p981_p12, 1, 0 }
  0x16   : > { %p654_p13 = pneg %p981_p12  ;;  %s743_s6 = scalar_lea.hbm %s1164_s0, 512 }
  0x17   : > { %s1181_s29 = scalar_select %p999_p2, 1, 0 }
  0x18   : > { %p993_p5 = pnand %p654_p13, %p957_p3  ;;  %p744_p7 = scmp.ne.s32.totalorder %s1164_s0, %s743_s6 }
  0x19   : > { %p750_p4 = scmp.lt.u32.totalorder %s743_s6, %s1164_s0 }
  0x1a   : > { %p745_p9 = pneg %p993_p5 }
  0x1c   : > { %p746_p11 = pnand %p745_p9, %p744_p7 }
  0x1e   : > { %p747_p13 = pneg %p746_p11 }
  0x20   : > { %p752_p1 = pnand %p750_p4, %p747_p13 }
  0x22   : > { %755 = shalt.err (!%p752_p1)
}
  0x23   : > { %s756_s11 = scalar_lea.vmem %s985_s27, 512  ;;  %p764_p6 = scmp.lt.s32.totalorder %s985_s27, %s985_s27 }
  0x24   : > { %p757_p0 = scmp.ne.s32.totalorder %s985_s27, %s756_s11  ;;  %p765_p3 = scmp.lt.s32.totalorder %s756_s11, %s756_s11 }
  0x26   : > { %p759_p10 = pnand %p757_p0, %p745_p9  ;;  %p766_p12 = por %p765_p3, %p764_p6 }
  0x28   : > { %p760_p8 = pneg %p759_p10 }
  0x2a   : > { %p767_p2 = pnand %p766_p12, %p760_p8 }
  0x2c   : > { %770 = shalt.err (!%p767_p2)
}
  0x2d   : > { %s890_s18 = smov 256   ;;  %s891_s19 = smov 16  }
  0x2e   : > { %657 = dma.hbm_to_vmem [thread:$0]  (!%p993_p5), %s1164_s0, 512, %s985_s27, [#allocation4], %s890_s18, %s890_s18, %s891_s19  }
  0x2f   : > { %p37_p10 = scmp.ge.s32.totalorder %s35_s30, 2  ;;  %s76_s4 = sadd.s32 1, %s875_s14 }
  0x30   : > { %s186_s5 = sand.u32 1, %s875_s14   ;;  %s598_s8 = sshll.u32 %s883_s16, 6 }
  0x31   : > { %s1195_s30 = smov (%p37_p10, %s35_s30), 0  ;;  %s597_s6 = sshll.u32 %s186_s5, 7 }
  0x32   : > { %s72_s7 = ssub.s32 %s883_s16, %s1195_s30  ;;  %s1035_s28 = scalar_lea.hbm %s1165_s1, %s598_s8 }
  0x33   : > { %p74_p3 = scmp.eq.s32.totalorder %s72_s7, 0  ;;  %s190_s27 = scalar_lea.vmem [#allocation6], %s597_s6 }
  0x34   : > { %s199_s11 = sshll.u32 %s190_s27, 4  ;;  %s1042_s19 = scalar_lea.sflag [#allocation7], %s186_s5  ;;  %s1040_s11 = int_to_ptr.vmem [resolvable:$true] %s199_s11 }
  0x35   : > { %s1038_s18 = scalar_select %p74_p3, %s875_s14, %s76_s4  }
  0x36   : > { %s771_s21 = scalar_lea.hbm %s1035_s28, 2048  ;;  %p1182_p8 = scmp.ne.s32.totalorder %s1181_s29, 0 }
  0x37   : > { %p772_p6 = scmp.ne.s32.totalorder %s1035_s28, %s771_s21  ;;  %s776_s8 = scalar_lea.hbm %s1165_s1, 4096 }
  0x38   : > { %p773_p12 = pneg %p1182_p8  ;;  %p777_p2 = scmp.lt.u32.totalorder %s1035_s28, %s1165_s1 }
  0x39   : > { %p778_p7 = scmp.lt.u32.totalorder %s776_s8, %s771_s21  ;;  %p780_p11 = scmp.lt.u32.totalorder %s771_s21, %s1035_s28 }
  0x3a   : > { %p774_p0 = pnand %p773_p12, %p772_p6 }
  0x3b   : > { %p779_p9 = por %p778_p7, %p777_p2 }
  0x3c   : > { %p775_p5 = pneg %p774_p0 }
  0x3d   : > { %p781_p13 = por %p780_p11, %p779_p9 }
  0x3f   : > { %p782_p4 = pnand %p781_p13, %p775_p5 }
  0x41   : > { %785 = shalt.err (!%p782_p4)
}
  0x42   : > { %s786_s4 = scalar_lea.vmem %s1040_s11, 2048  ;;  %s892_s5 = smov [#allocation6]  }
  0x43   : > { %p787_p1 = scmp.ne.s32.totalorder %s1040_s11, %s786_s4  ;;  %s791_s10 = sshll.u32 %s892_s5, 4  ;;  %s792_s10 = int_to_ptr.vmem [resolvable:$false] %s791_s10 }
  0x44   : > { %s793_s27 = scalar_lea.vmem %s792_s10, 4096  ;;  %p794_p6 = scmp.lt.s32.totalorder %s1040_s11, %s792_s10 }
  0x45   : > { %p789_p10 = pnand %p787_p1, %p773_p12  ;;  %p795_p0 = scmp.lt.s32.totalorder %s793_s27, %s786_s4 }
  0x47   : > { %p790_p3 = pneg %p789_p10  ;;  %p796_p2 = por %p795_p0, %p794_p6 }
  0x49   : > { %p797_p7 = pnand %p796_p2, %p790_p3 }
  0x4b   : > { %800 = shalt.err (!%p797_p7)
}
  0x4c   : > { %s893_s21 = smov 128   ;;  %s894_s26 = smov 64  }
  0x4d   : > { %s895_s7 = smov 4   ;;  %p1183_p12 = scmp.ne.s32.totalorder %s1179_s25, 0 }
  0x4e   : > { %661 = dma.hbm_to_vmem [thread:$0]  (!%p1182_p8), %s1035_s28, 2048, %s1040_s11, %s1042_s19, %s893_s21, %s894_s26, %s895_s7  }
  0x4f   : > { %217 = sbr.rel (%p1183_p12) target bundleno = 359 (0x167), region = 32  ;;  %p1184_p5 = scmp.ne.s32.totalorder (!%p1183_p12), %s1174_s20, 0 }
  0x56   : > { %854 = dma.done.wait (%p1184_p5), [#allocation4], 512  }
  0x57   : > { %856 = vsyncadd (%p1184_p5), [#allocation4], 4294966784  ;;  %s1077_s8 = sand.u32 1, %s871_s13   ;;  %p1185_p8 = scmp.ne.s32.totalorder %s1176_s22, 0 }
  0x58   : > { %s601_s6 = sshll.u32 %s1077_s8, 7  ;;  %s224_s9 = scalar_lea.sflag [#allocation7], %s1077_s8 }
  0x59   : > { %s1081_s4 = scalar_lea.vmem [#allocation6], %s601_s6 }
  0x5a   : > { %858 = dma.done.wait (%p1185_p8), %s224_s9, 2048  }
  0x5b   : > { %860 = vsyncadd (%p1185_p8), %s224_s9, 4294965248  ;;  %v727_v0 = vld [vmem:[%s1081_s4 + $0x40] sm:$0xff]   ;;  %v729_v2 = vld [vmem:[%s1081_s4 + $0x48] sm:$0xff]   ;;  %p256_p9 = scmp.lt.s32.totalorder %s879_s15, 1  ;;  %s602_s22 = sshll.u32 %s1077_s8, 4 }
  0x5c   : > { %v728_v1 = vld [vmem:[%s1081_s4] sm:$0xff]   ;;  %624 = vmatprep.subr.bf16.mxu0 %v727_v0  ;;  %v730_v3 = vld [vmem:[%s1081_s4 + $0x8] sm:$0xff]   ;;  %v731_v4 = vld [vmem:[%s1081_s4 + $0x50] sm:$0xff]   ;;  %s252_s11 = scalar_lea.vmem [#allocation8], %s602_s22  ;;  %s621_s5 = sshll.u32 %s879_s15, 7 }
  0x5d   : > { %625 = vmatpush3.bf16.msra.mxu0 %v728_v1  ;;  %v732_v5 = vld [vmem:[%s1081_s4 + $0x10] sm:$0xff]   ;;  %v733_v6 = vld [vmem:[%s1081_s4 + $0x58] sm:$0xff]   ;;  %v735_v8 = vld [vmem:[%s1081_s4 + $0x60] sm:$0xff]   ;;  %s257_s20 = scalar_select %p256_p9, %s879_s15, 1 }
  0x5e   : > { %626 = vmatprep.subr.bf16.mxu0 %v729_v2  ;;  %v734_v7 = vld [vmem:[%s1081_s4 + $0x18] sm:$0xff]   ;;  %v736_v9 = vld [vmem:[%s1081_s4 + $0x20] sm:$0xff]   ;;  %v737_v10 = vld [vmem:[%s1081_s4 + $0x68] sm:$0xff]   ;;  %s478_s19 = sshll.u32 %s252_s11, 4  ;;  %s1115_s21 = scalar_lea.hbm %s1167_s3, %s621_s5  ;;  %s1110_s19 = int_to_ptr.vmem [resolvable:$true] %s478_s19 }
  0x5f   : > { %v277_v11 = vld [vmem:[#allocation3 + $0x8] sm:$0xff]  ;;  %v279_v12 = vld [vmem:[#allocation3 + $0x18] sm:$0xff]  ;;  %v739_v15 = vld [vmem:[%s1081_s4 + $0x70] sm:$0xff]   ;;  %s258_s28 = scalar_lea.vmem %s1166_s2, %s257_s20  ;;  %s463_s26 = scalar_lea.sflag [#allocation5], %s1077_s8 }
  0x60   : > { %v281_v13 = vpack.c.bf16 %v279_v12, %v277_v11  ;;  %v738_v14 = vld [vmem:[%s1081_s4 + $0x28] sm:$0xff]   ;;  %v740_v16 = vld [vmem:[%s1081_s4 + $0x30] sm:$0xff]   ;;  %v741_v17 = vld [vmem:[%s1081_s4 + $0x78] sm:$0xff]   ;;  %s801_s7 = scalar_lea.vmem %s1110_s19, 256  ;;  %p1186_p13 = scmp.ne.s32.totalorder %s1177_s23, 0 }
  0x61   : > { %627 = vmatpush3.bf16.msra.mxu0 %v730_v3  ;;  %v742_v18 = vld [vmem:[%s1081_s4 + $0x38] sm:$0xff]   ;;  %v276_v19 = vld [vmem:[#allocation3] sm:$0xff]  ;;  %v278_v20 = vld [vmem:[#allocation3 + $0x10] sm:$0xff]  ;;  %p802_p11 = scmp.ne.s32.totalorder %s1110_s19, %s801_s7  ;;  %s896_s15 = smov [#allocation8]  }
  0x62   : > { %628 = vmatprep.subr.bf16.mxu0 %v731_v4  ;;  %442 = vmatprep.mubr.bf16.mxu0 %v281_v13  ;;  %v280_v21 = vpack.c.bf16 %v278_v20, %v276_v19  ;;  %v603_v23 = vld [vmem:[%s258_s28] ss:$0 sm:$0xff]  ;;  %s805_s6 = sshll.u32 %s896_s15, 4  ;;  %s806_s6 = int_to_ptr.vmem [resolvable:$false] %s805_s6 }
  0x63   : > { %p803_p4 = pnand %p802_p11, %p1186_p13  ;;  %s807_s9 = scalar_lea.vmem %s806_s6, 512 }
  0x64   : > { %p808_p10 = scmp.lt.s32.totalorder %s1110_s19, %s806_s6  ;;  %p809_p3 = scmp.lt.s32.totalorder %s807_s9, %s801_s7 }
  0x65   : > { %629 = vmatpush3.bf16.msra.mxu0 %v732_v5  ;;  %p804_p1 = pneg %p803_p4 }
  0x66   : > { %630 = vmatprep.subr.bf16.mxu0 %v733_v6  ;;  %p810_p6 = por %p809_p3, %p808_p10 }
  0x68   : > { %p811_p0 = pnand %p810_p6, %p804_p1 }
  0x69   : > { %631 = vmatpush3.bf16.msra.mxu0 %v734_v7 }
  0x6a   : > { %632 = vmatprep.subr.bf16.mxu0 %v735_v8 }
  0x6d   : > { %633 = vmatpush3.bf16.msra.mxu0 %v736_v9 }
  0x6e   : > { %634 = vmatprep.subr.bf16.mxu0 %v737_v10 }
  0x71   : > { %635 = vmatpush3.bf16.msra.mxu0 %v738_v14 }
  0x72   : > { %636 = vmatprep.subr.bf16.mxu0 %v739_v15 }
  0x75   : > { %637 = vmatpush3.bf16.msra.mxu0 %v740_v16 }
  0x76   : > { %638 = vmatprep.subr.bf16.mxu0 %v741_v17 }
  0x79   : > { %639 = vmatpush3.bf16.msra.mxu0 %v742_v18 }
  0x7c   : > { %443 = vmatmul.mubr.bf16.vlgmr.msra.gmra.mrb[0].mxu0 %v280_v21 }
 0x14f   : > { %v640_v22 = vpop.f32.mrb[0].mxu0 }
 0x150   : > { %v641_v24 = vpop.f32.mrb[1].mxu0 }
 0x151   : > { %v642_v25 = vadd.f32 %v641_v24, %v640_v22  ;;  %v643_v26 = vpop.f32.mrb[2].mxu0 }
 0x152   : > { %v644_v27 = vpop.f32.mrb[3].mxu0 }
 0x153   : > { %v451_v28 = vadd.f32 %v642_v25, %v603_v23  ;;  %v645_v29 = vadd.f32 %v644_v27, %v643_v26 }
 0x155   : > { %460 = vst [vmem:[%s252_s11] sm:$0xff] %v451_v28  ;;  %v452_v30 = vadd.f32 %v645_v29, %v603_v23 }
 0x157   : > { %461 = vst [vmem:[%s252_s11 + $0x8] sm:$0xff] %v452_v30 }
 0x158   : > { %814 = shalt.err (!%p811_p0)
}
 0x159   : > { %s815_s4 = scalar_lea.hbm %s1115_s21, 256  ;;  %s819_s25 = scalar_lea.hbm %s1167_s3, 512 }
 0x15a   : > { %p816_p2 = scmp.ne.s32.totalorder %s1115_s21, %s815_s4  ;;  %p820_p5 = scmp.lt.u32.totalorder %s1115_s21, %s1167_s3 }
 0x15b   : > { %p821_p8 = scmp.lt.u32.totalorder %s819_s25, %s815_s4  ;;  %p823_p11 = scmp.lt.u32.totalorder %s815_s4, %s1115_s21 }
 0x15c   : > { %p817_p7 = pnand %p816_p2, %p1186_p13 }
 0x15d   : > { %p822_p9 = por %p821_p8, %p820_p5 }
 0x15e   : > { %p818_p12 = pneg %p817_p7 }
 0x15f   : > { %p824_p4 = por %p823_p11, %p822_p9 }
 0x161   : > { %p825_p1 = pnand %p824_p4, %p818_p12 }
 0x163   : > { %828 = shalt.err (!%p825_p1)
}
 0x164   : > { %s897_s11 = smov 128   ;;  %s898_s5 = smov 256  }
 0x165   : > { %s899_s10 = smov 8  }
 0x166   : > { %652 = dma.vmem_to_hbm [thread:$0]  (%p1186_p13), %s1110_s19, 256, %s1115_s21, %s463_s26, %s897_s11, %s898_s5, %s899_s10  }
 0x167 PF: > { %s493_s27 = sand.u32 1, %s867_s12   ;;  %p1187_p10 = scmp.ne.s32.totalorder %s1178_s24, 0 }
 0x168   : > { %p1188_p3 = scmp.ge.s32.totalorder %s887_s17, 2  ;;  %s494_s7 = scalar_lea.sflag [#allocation5], %s493_s27 }
 0x16a   : > { %p663_p6 = pnand %p1188_p3, %p1187_p10 }
 0x16c   : > { %862 = dma.done.wait (!%p663_p6), %s494_s7, 256  }
 0x16d   : > { %864 = vsyncadd (!%p663_p6), %s494_s7, 4294967040  ;;  %s20_s17 = sadd.s32 1, %s887_s17   ;;  %s1189_s12 = smov %s871_s13 }
 0x16e   : > { %p17_p0 = scmp.ge.s32.totalorder %s20_s17, 4   ;;  %s1190_s13 = smov %s875_s14 }
 0x16f   : > { %s1191_s14 = smov %s1038_s18  ;;  %s1192_s15 = smov %s883_s16 }
 0x170   : > { %s1193_s16 = smov %s1195_s30  ;;  %19 = sbr.rel (!%p17_p0) target bundleno = 7 (0x7), region = 94 }
 0x177   :  { %499 = vsyncpa [#allocation4], 1 }
 0x178   :  { %501 = vsyncpa [#allocation4 + $0x1], 1 }
 0x179   :  { %502 = vsyncpa [#allocation7], 1 }
 0x17a   :  { %504 = vsyncpa [#allocation7 + $0x1], 1 }
 0x17b   :  { %505 = vsyncpa [#allocation5], 1 }
 0x17c   :  { %507 = vsyncpa [#allocation5 + $0x1], 1 }

</bundles_post_ra>
